<compile_context>
chip_gen: v5e
topology: v5e:2x2
jax: 0.10.0
libtpu: 0.0.40
codegen_flags: <defaults>
</compile_context>

<pallas_src>
import functools

import jax
import jax.numpy as jnp
from jax.experimental import pallas as pl
from jax.experimental.pallas import tpu as pltpu


def _rescale_kernel(scale_ref, shift_ref, idx_ref, x_ref, o_ref, *, num_species):
    """scale_ref/shift_ref: (S,) f32 in SMEM; idx_ref: (BR, LW) i32; x_ref/o_ref: (BR, LW)."""
    idx = idx_ref[...]
    x = x_ref[...].astype(jnp.float32)

    # Unrolled select chain over the small species table (pure VPU cmp + sel with
    # scalar broadcasts from SMEM).  Out-of-range indices fall back to species 0.
    # TODO(synk): for S >~ 16 switch to a log2(S) bit-select tree to stay off the
    # VALU ceiling on v7x.
    sc = jnp.full(x.shape, scale_ref[0], dtype=jnp.float32)
    sh = jnp.full(x.shape, shift_ref[0], dtype=jnp.float32)
    for s in range(1, num_species):
        m = idx == s
        sc = jnp.where(m, scale_ref[s], sc)
        sh = jnp.where(m, shift_ref[s], sh)

    o_ref[...] = (x * sc + sh).astype(o_ref.dtype)


def _round_up(v, m):
    return (v + m - 1) // m * m


def species_wise_rescale(x, indices, scale, shift, *, lane_width=512,
                         min_pallas_elements=131072):
    """x: (N, F), indices: (N,) int, scale/shift: (S,) -> (N, F)."""
    n, f = x.shape
    num_species = int(scale.shape[0])
    total = n * f
    out_dtype = jnp.result_type(x.dtype, scale.dtype)

    scale = scale.astype(jnp.float32)
    shift = shift.astype(jnp.float32)
    if indices.dtype != jnp.int32:
        indices = indices.astype(jnp.int32)

    # ---- Small-problem fast path: one fused XLA elementwise pass. ----
    if total < min_pallas_elements:
        return (x.astype(out_dtype) * scale[indices].reshape(-1, 1).astype(out_dtype)
                + shift[indices].reshape(-1, 1).astype(out_dtype))

    # ---- Pallas path: lane-dense (rows, lane_width) slab. ----
    x_flat = x.reshape(-1)
    # Broadcast per-atom index over the feature axis (no-op for F == 1).
    idx_flat = jnp.broadcast_to(indices[:, None], (n, f)).reshape(-1)

    padded_total = _round_up(total, lane_width)
    pad = padded_total - total
    if pad:
        # TODO(synk): handle the <lane_width tail in-kernel (manual DMA / masked
        # store) to eliminate this pad pass and the trailing slice entirely.
        x_flat = jnp.pad(x_flat, (0, pad))
        idx_flat = jnp.pad(idx_flat, (0, pad))

    rows = padded_total // lane_width
    x2d = x_flat.reshape(rows, lane_width)
    idx2d = idx_flat.reshape(rows, lane_width)

    # Block sizing: 2-8 grid steps for pipelining / megacore, blocks kept between
    # (8, 512) and (1024, 512).  Last block may overhang `rows`; OOB output
    # elements are dropped by Pallas and OOB inputs are never used.
    g_target = min(8, max(2, pl.cdiv(rows, 512)))
    block_rows = _round_up(pl.cdiv(rows, g_target), 8)
    block_rows = max(8, min(block_rows, 1024))
    block_rows = min(block_rows, _round_up(rows, 8))
    grid = (pl.cdiv(rows, block_rows),)

    kernel = functools.partial(_rescale_kernel, num_species=num_species)

    out2d = pl.pallas_call(
        kernel,
        out_shape=jax.ShapeDtypeStruct((rows, lane_width), out_dtype),
        grid_spec=pltpu.PrefetchScalarGridSpec(
            num_scalar_prefetch=2,          # scale, shift -> SMEM
            grid=grid,
            in_specs=[
                pl.BlockSpec((block_rows, lane_width), lambda i, sc, sh: (i, 0)),  # indices i32
                pl.BlockSpec((block_rows, lane_width), lambda i, sc, sh: (i, 0)),  # energies
            ],
            out_specs=pl.BlockSpec((block_rows, lane_width), lambda i, sc, sh: (i, 0)),
        ),
        compiler_params=pltpu.CompilerParams(
            dimension_semantics=("parallel",),   # megacore sharding on v7x
        ),
    )(scale, shift, idx2d, x2d)

    out_flat = out2d.reshape(-1)
    if pad:
        out_flat = out_flat[:total]
    return out_flat.reshape(n, f)


def _reference(x, indices, scale, shift):
    return x * scale[indices].reshape(-1, 1) + shift[indices].reshape(-1, 1)


if __name__ == "__main__":
    key = jax.random.PRNGKey(0)
    k_x1, k_i1, k_x2, k_i2, k_x3, k_i3 = jax.random.split(key, 6)

    num_species = 5
    shift = jnp.array([0.1 * i for i in range(num_species)], dtype=jnp.float32)
    scale = jnp.array([1.0 + 0.05 * i for i in range(num_species)], dtype=jnp.float32)

    # Case 1: unaligned size (pad + trailing trim + block overhang), forced Pallas path.
    n1, f1 = 777, 1
    x1 = jax.random.normal(k_x1, (n1, f1), dtype=jnp.float32)
    i1 = jax.random.randint(k_i1, (n1,), 0, num_species, dtype=jnp.int32)
    o1 = jax.block_until_ready(
        species_wise_rescale(x1, i1, scale, shift, min_pallas_elements=0))
    assert o1.shape == (n1, f1) and o1.dtype == jnp.float32
    assert jnp.allclose(o1, _reference(x1, i1, scale, shift), atol=1e-6, rtol=1e-6)

    # Case 2: lane-aligned size (no pad, no trailing slice), forced Pallas path.
    n2, f2 = 2048, 1
    x2 = jax.random.normal(k_x2, (n2, f2), dtype=jnp.float32)
    i2 = jax.random.randint(k_i2, (n2,), 0, num_species, dtype=jnp.int32)
    o2 = jax.block_until_ready(
        species_wise_rescale(x2, i2, scale, shift, min_pallas_elements=0))
    assert jnp.allclose(o2, _reference(x2, i2, scale, shift), atol=1e-6, rtol=1e-6)

    # Case 3: multi-block grid (>= 2 steps), forced Pallas path.
    n3, f3 = 16384, 1
    x3 = jax.random.normal(k_x3, (n3, f3), dtype=jnp.float32)
    i3 = jax.random.randint(k_i3, (n3,), 0, num_species, dtype=jnp.int32)
    o3 = jax.block_until_ready(
        species_wise_rescale(x3, i3, scale, shift, min_pallas_elements=0))
    assert jnp.allclose(o3, _reference(x3, i3, scale, shift), atol=1e-6, rtol=1e-6)

    # Case 4: default dispatch for a small problem -> fused jnp fast path.
    o4 = jax.block_until_ready(species_wise_rescale(x1, i1, scale, shift))
    assert jnp.allclose(o4, _reference(x1, i1, scale, shift), atol=1e-6, rtol=1e-6)

    print("KERNEL_OK")
</pallas_src>

<mosaic_0001>
module attributes {stable_mosaic.version = 11 : i64} {
  func.func @_rescale_kernel(%arg0: i32, %arg1: memref<5xf32, #tpu.memory_space<smem>>, %arg2: memref<5xf32, #tpu.memory_space<smem>>, %arg3: memref<8x512xi32, #tpu.memory_space<vmem>>, %arg4: memref<8x512xf32, #tpu.memory_space<vmem>>, %arg5: memref<8x512xf32, #tpu.memory_space<vmem>>) attributes {dimension_semantics = [#tpu.dimension_semantics<parallel>], iteration_bounds = array<i64: 1>, scalar_prefetch = 2 : i64, scratch_operands = 0 : i64, tpu.core_type = #tpu.core_type<tc>, window_params = [{transform_indices = @transform_0, window_bounds = array<i64: 8, 512>}, {transform_indices = @transform_1, window_bounds = array<i64: 8, 512>}, {transform_indices = @transform_2, window_bounds = array<i64: 8, 512>}]} {
    %c0 = arith.constant 0 : index
    %c0_0 = arith.constant 0 : index
    %0 = vector.load %arg3[%c0, %c0_0] : memref<8x512xi32, #tpu.memory_space<vmem>>, vector<8x512xi32>
    %c0_1 = arith.constant 0 : index
    %c0_2 = arith.constant 0 : index
    %1 = vector.load %arg4[%c0_1, %c0_2] : memref<8x512xf32, #tpu.memory_space<vmem>>, vector<8x512xf32>
    %c0_3 = arith.constant 0 : index
    %2 = memref.load %arg1[%c0_3] : memref<5xf32, #tpu.memory_space<smem>>
    %3 = vector.broadcast %2 : f32 to vector<8x512xf32>
    %c0_4 = arith.constant 0 : index
    %4 = memref.load %arg2[%c0_4] : memref<5xf32, #tpu.memory_space<smem>>
    %5 = vector.broadcast %4 : f32 to vector<8x512xf32>
    %c1_i32 = arith.constant 1 : i32
    %6 = vector.broadcast %c1_i32 : i32 to vector<8x512xi32>
    %7 = arith.cmpi eq, %0, %6 : vector<8x512xi32>
    %c1 = arith.constant 1 : index
    %8 = memref.load %arg1[%c1] : memref<5xf32, #tpu.memory_space<smem>>
    %9 = vector.broadcast %8 : f32 to vector<8x512xf32>
    %10 = arith.select %7, %9, %3 : vector<8x512xi1>, vector<8x512xf32>
    %c1_5 = arith.constant 1 : index
    %11 = memref.load %arg2[%c1_5] : memref<5xf32, #tpu.memory_space<smem>>
    %12 = vector.broadcast %11 : f32 to vector<8x512xf32>
    %13 = arith.select %7, %12, %5 : vector<8x512xi1>, vector<8x512xf32>
    %c2_i32 = arith.constant 2 : i32
    %14 = vector.broadcast %c2_i32 : i32 to vector<8x512xi32>
    %15 = arith.cmpi eq, %0, %14 : vector<8x512xi32>
    %c2 = arith.constant 2 : index
    %16 = memref.load %arg1[%c2] : memref<5xf32, #tpu.memory_space<smem>>
    %17 = vector.broadcast %16 : f32 to vector<8x512xf32>
    %18 = arith.select %15, %17, %10 : vector<8x512xi1>, vector<8x512xf32>
    %c2_6 = arith.constant 2 : index
    %19 = memref.load %arg2[%c2_6] : memref<5xf32, #tpu.memory_space<smem>>
    %20 = vector.broadcast %19 : f32 to vector<8x512xf32>
    %21 = arith.select %15, %20, %13 : vector<8x512xi1>, vector<8x512xf32>
    %c3_i32 = arith.constant 3 : i32
    %22 = vector.broadcast %c3_i32 : i32 to vector<8x512xi32>
    %23 = arith.cmpi eq, %0, %22 : vector<8x512xi32>
    %c3 = arith.constant 3 : index
    %24 = memref.load %arg1[%c3] : memref<5xf32, #tpu.memory_space<smem>>
    %25 = vector.broadcast %24 : f32 to vector<8x512xf32>
    %26 = arith.select %23, %25, %18 : vector<8x512xi1>, vector<8x512xf32>
    %c3_7 = arith.constant 3 : index
    %27 = memref.load %arg2[%c3_7] : memref<5xf32, #tpu.memory_space<smem>>
    %28 = vector.broadcast %27 : f32 to vector<8x512xf32>
    %29 = arith.select %23, %28, %21 : vector<8x512xi1>, vector<8x512xf32>
    %c4_i32 = arith.constant 4 : i32
    %30 = vector.broadcast %c4_i32 : i32 to vector<8x512xi32>
    %31 = arith.cmpi eq, %0, %30 : vector<8x512xi32>
    %c4 = arith.constant 4 : index
    %32 = memref.load %arg1[%c4] : memref<5xf32, #tpu.memory_space<smem>>
    %33 = vector.broadcast %32 : f32 to vector<8x512xf32>
    %34 = arith.select %31, %33, %26 : vector<8x512xi1>, vector<8x512xf32>
    %c4_8 = arith.constant 4 : index
    %35 = memref.load %arg2[%c4_8] : memref<5xf32, #tpu.memory_space<smem>>
    %36 = vector.broadcast %35 : f32 to vector<8x512xf32>
    %37 = arith.select %31, %36, %29 : vector<8x512xi1>, vector<8x512xf32>
    %38 = arith.mulf %1, %34 : vector<8x512xf32>
    %39 = arith.addf %38, %37 : vector<8x512xf32>
    %c0_9 = arith.constant 0 : index
    %c0_10 = arith.constant 0 : index
    %40 = vector.load %arg5[%c0_9, %c0_10] : memref<8x512xf32, #tpu.memory_space<vmem>>, vector<8x512xf32>
    tpu.vector_store %arg5[%c0_9, %c0_10], %39 {strides = array<i32>} : memref<8x512xf32, #tpu.memory_space<vmem>>, vector<8x512xf32>,
    return
  }
  func.func @transform_0(%arg0: i32, %arg1: memref<5xf32, #tpu.memory_space<smem>>, %arg2: memref<5xf32, #tpu.memory_space<smem>>) -> (i32, i32) {
    %c0_i32 = arith.constant 0 : i32
    %c0_i32_0 = arith.constant 0 : i32
    return %arg0, %c0_i32 : i32, i32
  }
  func.func @transform_1(%arg0: i32, %arg1: memref<5xf32, #tpu.memory_space<smem>>, %arg2: memref<5xf32, #tpu.memory_space<smem>>) -> (i32, i32) {
    %c0_i32 = arith.constant 0 : i32
    %c0_i32_0 = arith.constant 0 : i32
    return %arg0, %c0_i32 : i32, i32
  }
  func.func @transform_2(%arg0: i32, %arg1: memref<5xf32, #tpu.memory_space<smem>>, %arg2: memref<5xf32, #tpu.memory_space<smem>>) -> (i32, i32) {
    %c0_i32 = arith.constant 0 : i32
    %c0_i32_0 = arith.constant 0 : i32
    return %arg0, %c0_i32 : i32, i32
  }
}

</mosaic_0001>

<bundles_post_ra>
// kernel: tpu_custom_call.1
= control target key start
LH: loop header
LB: loop body
LE: loop exit
PB: predicated region body
PF: predicated region fallthrough
CT: control target
= control target key end

     0   :  { %s286_s21 = smov [#allocation3]   ;;  %s287_s22 = smov [#allocation4]   ;;  %s354_s0 = inlined_call_operand.hbm [shape: f32[5], index: 0, kind: input, shape index: {}]   ;;  %s355_s2 = inlined_call_operand.hbm [shape: s32[2,512], index: 2, kind: input, shape index: {}]   ;;  %s356_s3 = inlined_call_operand.hbm [shape: f32[2,512], index: 3, kind: input, shape index: {}]   ;;  %s357_s4 = inlined_call_operand.hbm [shape: f32[2,512], index: 4, kind: output, shape index: {}]   ;;  %s358_s1 = inlined_call_operand.hbm [shape: f32[5], index: 1, kind: input, shape index: {}]  }
   0x1   :  { %s10_s17 = sshll.u32 %s354_s0, 4  ;;  %s15_s20 = sshll.u32 %s358_s1, 4  ;;  %s11_s17 = int_to_ptr.hbm [resolvable:$true] %s10_s17  ;;  %s16_s20 = int_to_ptr.hbm [resolvable:$true] %s15_s20 }
   0x2   :  { %13 = dma.hbm_to_smem %s11_s17, 16, %s286_s21, [#allocation2] }
   0x3   :  { %18 = dma.hbm_to_smem %s16_s20, 16, %s287_s22, [#allocation2] }
   0x4   :  { %278 = dma.done.wait [#allocation2], 32 }
   0x5   :  { %279 = vsyncadd [#allocation2], 4294967264 }
   0x6   :  { %21 = sfence }
   0x7   :  { %22 = vsyncpa [#allocation6], 0 }
   0x8   :  { %23 = vsyncpa [#allocation9], 0 }
   0x9   :  { %24 = vsyncpa [#allocation7], 0 }
   0xa   :  { %28 = vsyncadd [#allocation6], 384  ;;  %s29_s0 = sshll.u32 %s355_s2, 4  ;;  %s288_s25 = smov [#allocation5]   ;;  %s30_s0 = int_to_ptr.hbm [resolvable:$true] %s29_s0 }
   0xb   :  { %s31_s1 = sshll.u32 %s288_s25, 4  ;;  %s289_s26 = smov 128   ;;  %s32_s1 = int_to_ptr.vmem [resolvable:$true] %s31_s1 }
   0xc   :  { %s290_s27 = smov 8  }
   0xd   :  { %37 = dma.hbm_to_vmem [thread:$0]  %s30_s0, 128, %s32_s1, [#allocation6], %s289_s26, %s289_s26, %s290_s27  }
   0xe   :  { %41 = vsyncadd [#allocation9], 384  ;;  %s42_s30 = sshll.u32 %s356_s3, 4  ;;  %s291_s5 = smov [#allocation8]   ;;  %s43_s30 = int_to_ptr.hbm [resolvable:$true] %s42_s30 }
   0xf   :  { %s44_s6 = sshll.u32 %s291_s5, 4  ;;  %s45_s6 = int_to_ptr.vmem [resolvable:$true] %s44_s6 }
  0x10   :  { %50 = dma.hbm_to_vmem [thread:$0]  %s43_s30, 128, %s45_s6, [#allocation9], %s289_s26, %s289_s26, %s290_s27  }
  0x11   :  { %280 = dma.done.wait [#allocation6], 512  }
  0x12   :  { %281 = vsyncadd [#allocation6], 4294966784 }
  0x13   :  { %282 = dma.done.wait [#allocation9], 512  }
  0x14   :  { %283 = vsyncadd [#allocation9], 4294966784  ;;  %s67_s2 = sld [smem:[#allocation3]]  ;;  %v59_v0 = vld [vmem:[#allocation5] sm:$0xff]  ;;  %v60_v2 = vld [vmem:[#allocation5 + $0x8] sm:$0xff] }
  0x15   :  { %s69_s7 = sld [smem:[#allocation4]]  ;;  %vm71_vm0 = vcmp.eq.s32.totalorder %v59_v0, 1  ;;  %vm87_vm1 = vcmp.eq.s32.totalorder %v59_v0, 2  ;;  %vm103_vm2 = vcmp.eq.s32.totalorder %v59_v0, 3  ;;  %vm119_vm3 = vcmp.eq.s32.totalorder %v59_v0, 4  ;;  %v61_v5 = vld [vmem:[#allocation5 + $0x10] sm:$0xff] }
  0x16   :  { %s167_s8 = sld [smem:[#allocation3 + $0x1]]  ;;  %vm72_vm4 = vcmp.eq.s32.totalorder %v60_v2, 1  ;;  %vm88_vm5 = vcmp.eq.s32.totalorder %v60_v2, 2  ;;  %vm104_vm6 = vcmp.eq.s32.totalorder %v60_v2, 3  ;;  %vm120_vm7 = vcmp.eq.s32.totalorder %v60_v2, 4  ;;  %v63_v19 = vld [vmem:[#allocation8] sm:$0xff] }
  0x17   :  { %s168_s9 = sld [smem:[#allocation4 + $0x1]]  ;;  %vm73_vm8 = vcmp.eq.s32.totalorder %v61_v5, 1  ;;  %v64_v22 = vld [vmem:[#allocation8 + $0x8] sm:$0xff]  ;;  %vm89_vm9 = vcmp.eq.s32.totalorder %v61_v5, 2  ;;  %v62_v28 = vld [vmem:[#allocation5 + $0x18] sm:$0xff]  ;;  %v65_v37 = vld [vmem:[#allocation8 + $0x10] sm:$0xff] }
  0x18   :  { %s169_s10 = sld [smem:[#allocation3 + $0x2]]  ;;  %vm105_vm10 = vcmp.eq.s32.totalorder %v61_v5, 3  ;;  %vm121_vm11 = vcmp.eq.s32.totalorder %v61_v5, 4  ;;  %vm74_vm12 = vcmp.eq.s32.totalorder %v62_v28, 1  ;;  %vm90_vm13 = vcmp.eq.s32.totalorder %v62_v28, 2  ;;  %v66_v48 = vld [vmem:[#allocation8 + $0x18] sm:$0xff] }
  0x19   :  { %s170_s11 = sld [smem:[#allocation4 + $0x2]]  ;;  %vm106_vm14 = vcmp.eq.s32.totalorder %v62_v28, 3  ;;  %vm122_vm15 = vcmp.eq.s32.totalorder %v62_v28, 4 }
  0x1a   :  { %v68_v1 = vstv %s67_s2  ;;  %s171_s3 = sld [smem:[#allocation3 + $0x3]] }
  0x1b   :  { %v70_v3 = vstv %s69_s7  ;;  %s172_s12 = sld [smem:[#allocation4 + $0x3]] }
  0x1c   :  { %v76_v4 = vstv %s167_s8  ;;  %s173_s13 = sld [smem:[#allocation3 + $0x4]] }
  0x1d   :  { %v77_v6 = vsel %vm71_vm0, %v76_v4, %v68_v1  ;;  %v82_v7 = vstv %s168_s9  ;;  %s174_s14 = sld [smem:[#allocation4 + $0x4]]  ;;  %v78_v8 = vsel %vm72_vm4, %v76_v4, %v68_v1  ;;  %v79_v18 = vsel %vm73_vm8, %v76_v4, %v68_v1 }
  0x1e   :  { %v83_v9 = vsel %vm71_vm0, %v82_v7, %v70_v3  ;;  %v92_v10 = vstv %s169_s10  ;;  %v84_v11 = vsel %vm72_vm4, %v82_v7, %v70_v3  ;;  %v85_v24 = vsel %vm73_vm8, %v82_v7, %v70_v3 }
  0x1f   :  { %v93_v12 = vsel %vm87_vm1, %v92_v10, %v77_v6  ;;  %v98_v13 = vstv %s170_s11  ;;  %v94_v14 = vsel %vm88_vm5, %v92_v10, %v78_v8  ;;  %v95_v32 = vsel %vm89_vm9, %v92_v10, %v79_v18 }
  0x20   :  { %v99_v15 = vsel %vm87_vm1, %v98_v13, %v83_v9  ;;  %v108_v16 = vstv %s171_s3  ;;  %v100_v17 = vsel %vm88_vm5, %v98_v13, %v84_v11  ;;  %v101_v38 = vsel %vm89_vm9, %v98_v13, %v85_v24 }
  0x21   :  { %v109_v20 = vsel %vm103_vm2, %v108_v16, %v93_v12  ;;  %v114_v21 = vstv %s172_s12  ;;  %v110_v23 = vsel %vm104_vm6, %v108_v16, %v94_v14  ;;  %v111_v41 = vsel %vm105_vm10, %v108_v16, %v95_v32 }
  0x22   :  { %v115_v25 = vsel %vm103_vm2, %v114_v21, %v99_v15  ;;  %v124_v26 = vstv %s173_s13  ;;  %v116_v27 = vsel %vm104_vm6, %v114_v21, %v100_v17  ;;  %v117_v42 = vsel %vm105_vm10, %v114_v21, %v101_v38 }
  0x23   :  { %v125_v29 = vsel %vm119_vm3, %v124_v26, %v109_v20  ;;  %v130_v30 = vstv %s174_s14  ;;  %v126_v31 = vsel %vm120_vm7, %v124_v26, %v110_v23  ;;  %v127_v43 = vsel %vm121_vm11, %v124_v26, %v111_v41 }
  0x24   :  { %v131_v33 = vsel %vm119_vm3, %v130_v30, %v115_v25  ;;  %v135_v34 = vmul.f32 %v125_v29, %v63_v19  ;;  %v132_v35 = vsel %vm120_vm7, %v130_v30, %v116_v27  ;;  %v136_v36 = vmul.f32 %v126_v31, %v64_v22 }
  0x25   :  { %v133_v44 = vsel %vm121_vm11, %v130_v30, %v117_v42  ;;  %v80_v45 = vsel %vm74_vm12, %v76_v4, %v68_v1  ;;  %v86_v46 = vsel %vm74_vm12, %v82_v7, %v70_v3  ;;  %v137_v47 = vmul.f32 %v127_v43, %v65_v37 }
  0x26   :  { %v139_v39 = vadd.f32 %v135_v34, %v131_v33  ;;  %v140_v40 = vadd.f32 %v136_v36, %v132_v35  ;;  %v96_v49 = vsel %vm90_vm13, %v92_v10, %v80_v45  ;;  %v102_v50 = vsel %vm90_vm13, %v98_v13, %v86_v46 }
  0x27   :  { %v141_v51 = vadd.f32 %v137_v47, %v133_v44  ;;  %v112_v52 = vsel %vm106_vm14, %v108_v16, %v96_v49  ;;  %v118_v53 = vsel %vm106_vm14, %v114_v21, %v102_v50 }
  0x28   :  { %143 = vst [vmem:[#allocation10] sm:$0xff] %v139_v39  ;;  %v128_v54 = vsel %vm122_vm15, %v124_v26, %v112_v52  ;;  %v134_v55 = vsel %vm122_vm15, %v130_v30, %v118_v53 }
  0x29   :  { %144 = vst [vmem:[#allocation10 + $0x8] sm:$0xff] %v140_v40  ;;  %v138_v56 = vmul.f32 %v128_v54, %v66_v48 }
  0x2a   :  { %145 = vst [vmem:[#allocation10 + $0x10] sm:$0xff] %v141_v51 }
  0x2b   :  { %v142_v57 = vadd.f32 %v138_v56, %v134_v55 }
  0x2d   :  { %146 = vst [vmem:[#allocation10 + $0x18] sm:$0xff] %v142_v57 }
  0x2e   :  { %150 = vsyncadd [#allocation7], 384  ;;  %s153_s17 = sshll.u32 %s357_s4, 4  ;;  %s292_s18 = smov [#allocation10]   ;;  %s154_s17 = int_to_ptr.hbm [resolvable:$true] %s153_s17 }
  0x2f   :  { %s151_s19 = sshll.u32 %s292_s18, 4  ;;  %s152_s19 = int_to_ptr.vmem [resolvable:$true] %s151_s19 }
  0x30   :  { %159 = dma.vmem_to_hbm [thread:$0]  %s152_s19, 128, %s154_s17, [#allocation7], %s289_s26, %s289_s26, %s290_s27  }
  0x31   :  { %284 = dma.done.wait [#allocation7], 512  }
  0x32   :  { %285 = vsyncadd [#allocation7], 4294966784 }
  0x33   :  { %164 = vsyncpa [#allocation6], 1 }
  0x34   :  { %165 = vsyncpa [#allocation9], 1 }
  0x35   :  { %166 = vsyncpa [#allocation7], 1 }

</bundles_post_ra>
